<compile_context>
chip_gen: v7x
topology: tpu7x:2x2x1
jax: 0.10.0
libtpu: 0.0.40
codegen_flags: <defaults>
</compile_context>

<pallas_src>
import jax
import jax.numpy as jnp
from jax.experimental import pallas as pl
from jax.experimental.pallas import tpu as pltpu


# ------------------------------ Pallas kernel --------------------------------

def _dilated_inception_kernel(x_ref, w_ref, o_ref):
    """One sample per grid step.

    x_ref: (Cin, S)      -- zero-padded spatial map, S = (H+2)*(W+2), spatial on lanes
    w_ref: (3*Cout, Cin) -- the three towers' 1x1 conv weights, concatenated row-wise
    o_ref: (3*Cout, S)   -- normalized + activated padded maps, tower-major channels
    """
    x = x_ref[...]
    w = w_ref[...]

    # 1x1 conv over the padded map == channel matmul on the MXU, f32 accumulation.
    y = jnp.dot(w, x, preferred_element_type=jnp.float32)        # (3*Cout, S)

    # InstanceNorm2d per (sample, channel): biased stats over the padded map,
    # eps=1e-5, affine=False (PyTorch defaults).  Centered variance for stability.
    inv_n = 1.0 / float(y.shape[1])
    mean = jnp.sum(y, axis=1, keepdims=True) * inv_n             # (3*Cout, 1)
    centered = y - mean
    var = jnp.sum(centered * centered, axis=1, keepdims=True) * inv_n
    yn = centered * jax.lax.rsqrt(var + 1e-5)

    # LeakyReLU(0.2) fused into the single dense store.
    o_ref[...] = jnp.where(yn >= 0.0, yn, 0.2 * yn)


# ------------------------------ wrapper ---------------------------------------

def dilated_inception_block(w_stack, x_nchw):
    """Forward pass of DilatedInceptionBlock.

    w_stack: (3, Cin, Cout) -- the towers' 1x1 conv weights (PyTorch weight[co, ci, 0, 0]
             transposed to [ci, co]).
    x_nchw:  (N, Cin, H, W)
    returns: (N, Cout, H+2, 3*(W+2))  == torch.cat([t0, t1, t2], dim=3)
    """
    N, Cin, H, W = x_nchw.shape
    n_towers, Cin2, Cout = w_stack.shape
    assert n_towers == 3 and Cin2 == Cin
    Hp, Wp = H + 2, W + 2
    S = Hp * Wp
    C3 = 3 * Cout

    # Fold the conv's padding=1 into the input (zeros conv to zeros, no bias).
    # NCHW pad + reshape -> (N, Cin, S): no transpose, channels on sublanes,
    # padded spatial map on the lane axis.
    x_pad = jnp.pad(x_nchw.astype(jnp.float32),
                    ((0, 0), (0, 0), (1, 1), (1, 1))).reshape(N, Cin, S)

    # Concatenate the three towers' weights row-wise: row t*Cout + co -> w[t, :, co].
    w_cat = jnp.transpose(w_stack.astype(jnp.float32), (0, 2, 1)).reshape(C3, Cin)

    out = pl.pallas_call(
        _dilated_inception_kernel,
        out_shape=jax.ShapeDtypeStruct((N, C3, S), jnp.float32),
        grid=(N,),
        in_specs=[
            pl.BlockSpec((None, Cin, S), lambda n: (n, 0, 0)),
            pl.BlockSpec((C3, Cin), lambda n: (0, 0)),
        ],
        out_specs=pl.BlockSpec((None, C3, S), lambda n: (n, 0, 0)),
        compiler_params=pltpu.CompilerParams(
            dimension_semantics=("parallel",)),
    )(x_pad, w_cat)

    # (N, 3*Cout, S) -> (N, 3, Cout, Hp, Wp) -> (N, Cout, Hp, 3, Wp) -> width concat.
    out = out.reshape(N, 3, Cout, Hp, Wp)
    return jnp.transpose(out, (0, 2, 3, 1, 4)).reshape(N, Cout, Hp, 3 * Wp)


# ------------------------------ pure-JAX reference ----------------------------

def reference_forward(w_stack, x_nchw):
    """Independent pure-JAX (no Pallas) reference of the PyTorch forward."""
    outs = []
    for t in range(3):
        # 1x1 conv, no bias (dilation is irrelevant for a 1x1 kernel).
        y = jnp.einsum("nchw,cd->ndhw", x_nchw, w_stack[t], precision="highest")
        # padding=1 around the spatial map (Conv2d pads the input; 1x1 of zeros = 0).
        y = jnp.pad(y, ((0, 0), (0, 0), (1, 1), (1, 1)))
        # InstanceNorm2d (biased stats over the padded map) + LeakyReLU(0.2).
        mean = jnp.mean(y, axis=(2, 3), keepdims=True)
        var = jnp.mean((y - mean) ** 2, axis=(2, 3), keepdims=True)
        y = (y - mean) / jnp.sqrt(var + 1e-5)
        outs.append(jnp.where(y >= 0.0, y, 0.2 * y))
    return jnp.concatenate(outs, axis=3)


# ------------------------------ main -------------------------------------------

if __name__ == "__main__":
    in_chans, out_chans = 4, 8
    N, H, W = 2, 16, 16

    key = jax.random.PRNGKey(0)
    wkey, xkey = jax.random.split(key)
    w_stack = (jax.random.normal(wkey, (3, in_chans, out_chans), jnp.float32)
               / float(in_chans) ** 0.5)
    x = jax.random.normal(xkey, (N, in_chans, H, W), jnp.float32)

    fwd = jax.jit(dilated_inception_block)
    out = jax.block_until_ready(fwd(w_stack, x))

    assert out.shape == (N, out_chans, H + 2, 3 * (W + 2)), out.shape
    assert bool(jnp.all(jnp.isfinite(out)))

    ref = reference_forward(w_stack, x)
    max_err = float(jnp.max(jnp.abs(out - ref)))
    assert max_err < 5e-3, f"mismatch vs reference: {max_err}"

    print("KERNEL_OK")
</pallas_src>

<mosaic_0001>
module attributes {stable_mosaic.version = 11 : i64} {
  func.func @_dilated_inception_kernel(%arg0: i32, %arg1: memref<1x4x324xf32, #tpu.memory_space<vmem>>, %arg2: memref<24x4xf32, #tpu.memory_space<vmem>>, %arg3: memref<1x24x324xf32, #tpu.memory_space<vmem>>) attributes {dimension_semantics = [#tpu.dimension_semantics<parallel>], iteration_bounds = array<i64: 2>, scalar_prefetch = 0 : i64, scratch_operands = 0 : i64, tpu.core_type = #tpu.core_type<tc>, window_params = [{transform_indices = @transform_0, window_bounds = array<i64: 1, 4, 324>}, {pipeline_mode = #tpu.pipeline_mode<synchronous>, transform_indices = @transform_1, window_bounds = array<i64: 24, 4>}, {transform_indices = @transform_2, window_bounds = array<i64: 1, 24, 324>}]} {
    %c0 = arith.constant 0 : index
    %c0_0 = arith.constant 0 : index
    %c0_1 = arith.constant 0 : index
    %0 = vector.load %arg1[%c0, %c0_0, %c0_1] : memref<1x4x324xf32, #tpu.memory_space<vmem>>, vector<1x4x324xf32>
    %1 = vector.shape_cast %0 : vector<1x4x324xf32> to vector<4x324xf32>
    %c0_2 = arith.constant 0 : index
    %c0_3 = arith.constant 0 : index
    %2 = vector.load %arg2[%c0_2, %c0_3] : memref<24x4xf32, #tpu.memory_space<vmem>>, vector<24x4xf32>
    %cst = arith.constant dense<0.000000e+00> : vector<24x324xf32>
    %3 = tpu.matmul %2, %1, %cst {dimension_numbers = #tpu.dot_dimension_numbers<[1], [0], [0], [1], [0, 0, 1, 1], [], []>} : vector<24x4xf32>, vector<4x324xf32>, vector<24x324xf32> -> vector<24x324xf32>
    %cst_4 = arith.constant dense<0.000000e+00> : vector<24xf32>
    %4 = vector.multi_reduction <add>, %3, %cst_4 [1] : vector<24x324xf32> to vector<24xf32>
    %5 = vector.shape_cast %4 : vector<24xf32> to vector<24x1xf32>
    %cst_5 = arith.constant 0.00308641978 : f32
    %6 = vector.broadcast %cst_5 : f32 to vector<24x1xf32>
    %7 = arith.mulf %5, %6 : vector<24x1xf32>
    %8 = vector.broadcast %7 : vector<24x1xf32> to vector<24x324xf32>
    %9 = arith.subf %3, %8 : vector<24x324xf32>
    %10 = arith.mulf %9, %9 : vector<24x324xf32>
    %cst_6 = arith.constant dense<0.000000e+00> : vector<24xf32>
    %11 = vector.multi_reduction <add>, %10, %cst_6 [1] : vector<24x324xf32> to vector<24xf32>
    %12 = vector.shape_cast %11 : vector<24xf32> to vector<24x1xf32>
    %cst_7 = arith.constant 0.00308641978 : f32
    %13 = vector.broadcast %cst_7 : f32 to vector<24x1xf32>
    %14 = arith.mulf %12, %13 : vector<24x1xf32>
    %cst_8 = arith.constant 9.99999974E-6 : f32
    %15 = vector.broadcast %cst_8 : f32 to vector<24x1xf32>
    %16 = arith.addf %14, %15 : vector<24x1xf32>
    %17 = math.rsqrt %16 : vector<24x1xf32>
    %18 = vector.broadcast %17 : vector<24x1xf32> to vector<24x324xf32>
    %19 = arith.mulf %9, %18 : vector<24x324xf32>
    %cst_9 = arith.constant 0.000000e+00 : f32
    %20 = vector.broadcast %cst_9 : f32 to vector<24x324xf32>
    %21 = arith.cmpf oge, %19, %20 : vector<24x324xf32>
    %cst_10 = arith.constant 2.000000e-01 : f32
    %22 = vector.broadcast %cst_10 : f32 to vector<24x324xf32>
    %23 = arith.mulf %22, %19 : vector<24x324xf32>
    %24 = arith.select %21, %19, %23 : vector<24x324xi1>, vector<24x324xf32>
    %c0_11 = arith.constant 0 : index
    %c0_12 = arith.constant 0 : index
    %c0_13 = arith.constant 0 : index
    %25 = vector.load %arg3[%c0_11, %c0_12, %c0_13] : memref<1x24x324xf32, #tpu.memory_space<vmem>>, vector<1x24x324xf32>
    %26 = vector.shape_cast %25 : vector<1x24x324xf32> to vector<24x324xf32>
    %27 = vector.shape_cast %24 : vector<24x324xf32> to vector<1x24x324xf32>
    tpu.vector_store %arg3[%c0_11, %c0_12, %c0_13], %27 {strides = array<i32>} : memref<1x24x324xf32, #tpu.memory_space<vmem>>, vector<1x24x324xf32>,
    return
  }
  func.func @transform_0(%arg0: i32) -> (i32, i32, i32) {
    %c0_i32 = arith.constant 0 : i32
    %c0_i32_0 = arith.constant 0 : i32
    %c0_i32_1 = arith.constant 0 : i32
    return %arg0, %c0_i32, %c0_i32_0 : i32, i32, i32
  }
  func.func @transform_1(%arg0: i32) -> (i32, i32) {
    %c0_i32 = arith.constant 0 : i32
    %c0_i32_0 = arith.constant 0 : i32
    %c0_i32_1 = arith.constant 0 : i32
    return %c0_i32, %c0_i32_0 : i32, i32
  }
  func.func @transform_2(%arg0: i32) -> (i32, i32, i32) {
    %c0_i32 = arith.constant 0 : i32
    %c0_i32_0 = arith.constant 0 : i32
    %c0_i32_1 = arith.constant 0 : i32
    return %arg0, %c0_i32, %c0_i32_0 : i32, i32, i32
  }
}

</mosaic_0001>

<bundles_post_ra>
// kernel: dilated_inception_block.1
= control target key start
LH: loop header
LB: loop body
LE: loop exit
PB: predicated region body
PF: predicated region fallthrough
CT: control target
= control target key end

     0   :  { %s570_s9 = smov 0   ;;  %s629_s0 = inlined_call_operand.vmem [shape: f32[2,4,324], index: 0, kind: input, shape index: {}]   ;;  %s630_s1 = inlined_call_operand.vmem [shape: f32[24,4], index: 1, kind: input, shape index: {}]   ;;  %s631_s2 = inlined_call_operand.vmem [shape: f32[2,24,324], index: 2, kind: output, shape index: {}]  }
   0x1 LB: > { %s493_s10 = sadd.s32 4294967295, %s551_s9   ;;  %p497_p0 = scmp.ge.s32.totalorder %s551_s9, 1  ;;  %s551_s9 = sphi %s570_s9, %s12_s9  }
   0x2   : > { %p112_p1 = scmp.lt.s32.totalorder %s551_s9, 3 }
   0x4   : > { %p113_p2 = pnand %p497_p0, %p112_p1 }
   0x5   : > { %p134_p3 = scmp.lt.s32.totalorder (!%p113_p2), %s493_s10, 1  ;;  %v553_v0 = vmov (!%p113_p2), 0.0   ;;  %vm554_vm0 = vmmov (!%p113_p2), 0   ;;  %v146_v1 = vld [vmem:[%s630_s1] sm:$0xff] (!%p113_p2)  ;;  %vm152_vm1 = vcmask (!%p113_p2), 31744   ;;  %vm162_vm2 = vcmask (!%p113_p2), 1043456  }
   0x6   : > { %116 = sbr.rel (%p113_p2) target bundleno = 564 (0x234), region = 28  ;;  %233 = vmatprep.mubr.f32.mxu0 (!%p113_p2), %v553_v0  ;;  %515 = vmatprep.subr.mxu1 (!%p113_p2), %v553_v0  ;;  %v147_v5 = vld [vmem:[%s630_s1 + $0x8] sm:$0xff] (!%p113_p2)  ;;  %v148_v6 = vld [vmem:[%s630_s1 + $0x10] sm:$0xff] (!%p113_p2)  ;;  %vm333_vm3 = vcmask (!%p113_p2), 556032  }
   0x7   : > { %517 = vmatprep.mubr.msk.f32.mxu1 (!%p113_p2), %vm554_vm0, %v553_v0 }
   0xd   : > { %s633_s10 = smov (!%p134_p3, %s493_s10), 1 }
   0xe   : > { %s526_s11 = smul.u32 12, %s633_s10 }
   0xf   : > { %s527_s21 = smul.u32 72, %s633_s10 }
  0x10   : > { %s138_s14 = scalar_lea.vmem %s629_s0, %s526_s11 }
  0x11   : > { %v144_v2 = vld [vmem:[%s138_s14] sm:$0xff]  ;;  %v145_v3 = vld [vmem:[%s138_s14 + $0x8] sm:$0xf]  ;;  %s612_s24 = scalar_lea.vmem %s631_s2, %s527_s21 }
  0x12   : > { %v151_v4 = vcombine.high %v144_v2, %v144_v2  ;;  %516 = vmatpush3.msk.msra.mxu1 %vm162_vm2, %v145_v3 }
  0x13   : > { %518 = vmatmul.mubr.msk.f32.vlgmr.msra.gmra.mrb[0].mxu1 %vm152_vm1, %v146_v1 }
  0x14   : > { %500 = vmatprep.subr.msk.mxu0 %vm162_vm2, %v151_v4  ;;  %520 = vmatprep.mubr.msk.f32.mxu1 %vm554_vm0, %v553_v0 }
  0x15   : > { %501 = vmatpush1.msk.msra.mxu0 %vm162_vm2, %v144_v2 }
  0x16   : > { %502 = vmatmul.mubr.msk.f32.vlgmr.msra.gmra.mrb[0].mxu0 %vm152_vm1, %v146_v1 }
  0x17   : > { %239 = vmatprep.mubr.f32.mxu0 %v553_v0  ;;  %521 = vmatmul.mubr.msk.f32.gmra.mrb[2].mxu1 %vm152_vm1, %v147_v5 }
  0x18   : > { %523 = vmatprep.mubr.msk.f32.mxu1 %vm554_vm0, %v553_v0 }
  0x1a   : > { %503 = vmatmul.mubr.msk.f32.gmra.mrb[2].mxu0 %vm152_vm1, %v147_v5 }
  0x1b   : > { %245 = vmatprep.mubr.f32.mxu0 %v553_v0  ;;  %524 = vmatmul.mubr.msk.f32.gmra.mrb[4].mxu1 %vm152_vm1, %v148_v6 }
  0x1e   : > { %504 = vmatmul.mubr.msk.f32.gmra.mrb[4].mxu0 %vm152_vm1, %v148_v6 }
  0xe6   : > { %v318_v7 = vpop.f32.mrb[0].mxu1 }
  0xe7   : > { %v519_v8 = vpop.f32.mrb[1].mxu1  ;;  %v334_v12 = vsel %vm333_vm3, %v318_v7, 0.0 }
  0xe9   : > { %v235_v9 = vpop.f32.mrb[0].mxu0 }
  0xea   : > { %v237_v10 = vpop.f32.mrb[1].mxu0  ;;  %v323_v11 = vpop.f32.mrb[2].mxu1 }
  0xeb   : > { %v332_v13 = vadd.f32 %v237_v10, %v235_v9  ;;  %v522_v14 = vpop.f32.mrb[3].mxu1  ;;  %v339_v18 = vsel %vm333_vm3, %v323_v11, 0.0 }
  0xed   : > { %v241_v15 = vpop.f32.mrb[2].mxu0  ;;  %v335_v16 = vadd.f32 %v334_v12, %v332_v13 }
  0xee   : > { %v243_v17 = vpop.f32.mrb[3].mxu0  ;;  %v328_v19 = vpop.f32.mrb[4].mxu1 }
  0xef   : > { %v338_v20 = vadd.f32 %v243_v17, %v241_v15  ;;  %336 = vadd.xlane.f32.xlu0 %v335_v16  ;;  %v525_v21 = vpop.f32.mrb[5].mxu1  ;;  %v344_v25 = vsel %vm333_vm3, %v328_v19, 0.0 }
  0xf1   : > { %v247_v22 = vpop.f32.mrb[4].mxu0  ;;  %v340_v23 = vadd.f32 %v339_v18, %v338_v20 }
  0xf2   : > { %v249_v24 = vpop.f32.mrb[5].mxu0 }
  0xf3   : > { %v343_v26 = vadd.f32 %v249_v24, %v247_v22  ;;  %341 = vadd.xlane.f32.xlu0 %v340_v23 }
  0xf5   : > { %v345_v27 = vadd.f32 %v344_v25, %v343_v26 }
  0xf7   : > { %346 = vadd.xlane.f32.xlu1 %v345_v27 }
 0x17c   : > { %v337_v28 = vpop.xlane.xlu0 %336 }
 0x17d   : > { %v348_v29 = vmul.f32 0.0030864198, %v337_v28 }
 0x17f   : > { %v351_v30 = vsub.f32 %v235_v9, %v348_v29  ;;  %v352_v31 = vsub.f32 %v237_v10, %v348_v29  ;;  %v353_v32 = vsub.f32 %v318_v7, %v348_v29 }
 0x180   : > { %v342_v33 = vpop.xlane.xlu0 %341 }
 0x181   : > { %v349_v34 = vmul.f32 0.0030864198, %v342_v33  ;;  %v360_v35 = vmul.f32 %v351_v30, %v351_v30  ;;  %v361_v36 = vmul.f32 %v352_v31, %v352_v31  ;;  %v362_v37 = vmul.f32 %v353_v32, %v353_v32 }
 0x183   : > { %v354_v38 = vsub.f32 %v241_v15, %v349_v34  ;;  %v355_v39 = vsub.f32 %v243_v17, %v349_v34  ;;  %v356_v40 = vsub.f32 %v323_v11, %v349_v34  ;;  %v369_v41 = vadd.f32 %v361_v36, %v360_v35 }
 0x184   : > { %v347_v42 = vpop.xlane.xlu1 %346  ;;  %v370_v43 = vsel %vm333_vm3, %v362_v37, 0.0 }
 0x185   : > { %v350_v44 = vmul.f32 0.0030864198, %v347_v42  ;;  %v371_v45 = vadd.f32 %v370_v43, %v369_v41  ;;  %v363_v46 = vmul.f32 %v354_v38, %v354_v38  ;;  %v364_v47 = vmul.f32 %v355_v39, %v355_v39 }
 0x186   : > { %v365_v48 = vmul.f32 %v356_v40, %v356_v40 }
 0x187   : > { %v357_v49 = vsub.f32 %v247_v22, %v350_v44  ;;  %v358_v50 = vsub.f32 %v249_v24, %v350_v44  ;;  %v359_v51 = vsub.f32 %v328_v19, %v350_v44  ;;  %372 = vadd.xlane.f32.xlu1 %v371_v45  ;;  %v374_v52 = vadd.f32 %v364_v47, %v363_v46 }
 0x188   : > { %v375_v53 = vsel %vm333_vm3, %v365_v48, 0.0 }
 0x189   : > { %v376_v54 = vadd.f32 %v375_v53, %v374_v52  ;;  %v366_v55 = vmul.f32 %v357_v49, %v357_v49  ;;  %v367_v56 = vmul.f32 %v358_v50, %v358_v50  ;;  %v368_v57 = vmul.f32 %v359_v51, %v359_v51 }
 0x18b   : > { %377 = vadd.xlane.f32.xlu0 %v376_v54  ;;  %v379_v58 = vadd.f32 %v367_v56, %v366_v55  ;;  %v380_v59 = vsel %vm333_vm3, %v368_v57, 0.0 }
 0x18d   : > { %v381_v60 = vadd.f32 %v380_v59, %v379_v58 }
 0x18f   : > { %382 = vadd.xlane.f32.xlu1 %v381_v60 }
 0x214   : > { %v373_v61 = vpop.xlane.xlu1 %372 }
 0x215   : > { %v384_v62 = vmul.f32 0.0030864198, %v373_v61 }
 0x217   : > { %v387_v63 = vadd.f32 1e-05, %v384_v62 }
 0x218   : > { %v378_v0 = vpop.xlane.xlu0 %377 }
 0x219   : > { %539 = vrsqrt.f32 %v387_v63  ;;  %v385_v1 = vmul.f32 0.0030864198, %v378_v0 }
 0x21b   : > { %v388_v2 = vadd.f32 1e-05, %v385_v1 }
 0x21c   : > { %v383_v3 = vpop.xlane.xlu1 %382 }
 0x21d   : > { %541 = vrsqrt.f32 %v388_v2  ;;  %v386_v4 = vmul.f32 0.0030864198, %v383_v3 }
 0x21f   : > { %v389_v5 = vadd.f32 1e-05, %v386_v4 }
 0x221   : > { %543 = vrsqrt.f32 %v389_v5 }
 0x223   : > { %v540_v6 = vpop.eup %539 }
 0x224   : > { %v393_v7 = vmul.f32 %v540_v6, %v351_v30  ;;  %v394_v8 = vmul.f32 %v540_v6, %v352_v31  ;;  %v395_v9 = vmul.f32 %v540_v6, %v353_v32 }
 0x226   : > { %vm402_vm4 = vcmp.ge.f32.partialorder %v393_v7, 0.0  ;;  %vm403_vm5 = vcmp.ge.f32.partialorder %v394_v8, 0.0  ;;  %vm404_vm6 = vcmp.ge.f32.partialorder %v395_v9, 0.0  ;;  %v411_v10 = vmul.f32 0.2, %v393_v7 }
 0x227   : > { %v542_v11 = vpop.eup %541  ;;  %v412_v12 = vmul.f32 0.2, %v394_v8  ;;  %v413_v13 = vmul.f32 0.2, %v395_v9 }
 0x228   : > { %v420_v14 = vsel %vm402_vm4, %v393_v7, %v411_v10  ;;  %v396_v15 = vmul.f32 %v542_v11, %v354_v38  ;;  %v397_v16 = vmul.f32 %v542_v11, %v355_v39  ;;  %v398_v17 = vmul.f32 %v542_v11, %v356_v40 }
 0x229   : > { %v421_v18 = vsel %vm403_vm5, %v394_v8, %v412_v12  ;;  %v422_v19 = vsel %vm404_vm6, %v395_v9, %v413_v13  ;;  %429 = vst [vmem:[%s612_s24] sm:$0xff] %v420_v14 }
 0x22a   : > { %430 = vst [vmem:[%s612_s24 + $0x8] sm:$0xff] %v421_v18  ;;  %431 = vst.msk [vmem:[%s612_s24 + $0x10] sm:$0xff] %vm333_vm3, %v422_v19  ;;  %vm405_vm7 = vcmp.ge.f32.partialorder %v396_v15, 0.0  ;;  %vm406_vm8 = vcmp.ge.f32.partialorder %v397_v16, 0.0  ;;  %vm407_vm9 = vcmp.ge.f32.partialorder %v398_v17, 0.0 }
 0x22b   : > { %v414_v20 = vmul.f32 0.2, %v396_v15  ;;  %v544_v21 = vpop.eup %543  ;;  %v415_v22 = vmul.f32 0.2, %v397_v16  ;;  %v416_v23 = vmul.f32 0.2, %v398_v17 }
 0x22c   : > { %v399_v25 = vmul.f32 %v544_v21, %v357_v49  ;;  %v400_v26 = vmul.f32 %v544_v21, %v358_v50  ;;  %v401_v27 = vmul.f32 %v544_v21, %v359_v51 }
 0x22d   : > { %v423_v24 = vsel %vm405_vm7, %v396_v15, %v414_v20  ;;  %v424_v28 = vsel %vm406_vm8, %v397_v16, %v415_v22  ;;  %v425_v29 = vsel %vm407_vm9, %v398_v17, %v416_v23 }
 0x22e   : > { %432 = vst [vmem:[%s612_s24 + $0x18] sm:$0xff] %v423_v24  ;;  %433 = vst [vmem:[%s612_s24 + $0x20] sm:$0xff] %v424_v28  ;;  %vm408_vm10 = vcmp.ge.f32.partialorder %v399_v25, 0.0  ;;  %vm409_vm11 = vcmp.ge.f32.partialorder %v400_v26, 0.0  ;;  %vm410_vm12 = vcmp.ge.f32.partialorder %v401_v27, 0.0 }
 0x22f   : > { %434 = vst.msk [vmem:[%s612_s24 + $0x28] sm:$0xff] %vm333_vm3, %v425_v29  ;;  %v417_v30 = vmul.f32 0.2, %v399_v25  ;;  %v418_v31 = vmul.f32 0.2, %v400_v26 }
 0x230   : > { %v419_v32 = vmul.f32 0.2, %v401_v27 }
 0x231   : > { %v426_v33 = vsel %vm408_vm10, %v399_v25, %v417_v30  ;;  %v427_v34 = vsel %vm409_vm11, %v400_v26, %v418_v31 }
 0x232   : > { %v428_v35 = vsel %vm410_vm12, %v401_v27, %v419_v32  ;;  %435 = vst [vmem:[%s612_s24 + $0x30] sm:$0xff] %v426_v33  ;;  %436 = vst [vmem:[%s612_s24 + $0x38] sm:$0xff] %v427_v34 }
 0x233   : > { %437 = vst.msk [vmem:[%s612_s24 + $0x40] sm:$0xff] %vm333_vm3, %v428_v35 }
 0x234 PF: > { %s12_s9 = sadd.s32 1, %s551_s9  }
 0x235   : > { %p9_p4 = scmp.ge.s32.totalorder %s12_s9, 4  }
 0x237   :  { %11 = sbr.rel (!%p9_p4) target bundleno = 1 (0x1), region = 58 }

</bundles_post_ra>
